<compile_context>
chip_gen: v6e
topology: v6e:2x2x1
jax: 0.10.0
libtpu: 0.0.40
codegen_flags: <defaults>
</compile_context>

<pallas_src>
import functools

import jax
import jax.numpy as jnp
import numpy as np
from jax.experimental import pallas as pl
from jax.experimental.pallas import tpu as pltpu


def _cdiv(a: int, b: int) -> int:
    return -(-a // b)


def _round_up(n: int, m: int) -> int:
    return _cdiv(n, m) * m


def _ipow(x, n: int):
    """x ** n for a static integer n >= 1 via exponentiation-by-squaring.

    Pure VPU multiplies -> zero per-element EUP (transcendental) work."""
    result = None
    base = x
    while n:
        if n & 1:
            result = base if result is None else result * base
        n >>= 1
        if n:
            base = base * base
    return result


def _gem_mean_static_kernel(x_ref, o_ref, *, eps: float, inv_hw: float, p_int: int):
    """o[r, 0] = mean_j clamp(x[r, j], eps) ** p_int   (integer-p VPU fast path)."""
    x = x_ref[...].astype(jnp.float32)            # native-dtype tile -> f32 math
    xc = jnp.maximum(x, eps)
    xp = _ipow(xc, p_int)                         # VPU multiplies only
    o_ref[...] = jnp.sum(xp, axis=-1, keepdims=True) * inv_hw


def _gem_mean_dynamic_kernel(p_ref, x_ref, o_ref, *, eps: float, inv_hw: float):
    """o[r, 0] = mean_j clamp(x[r, j], eps) ** p   (runtime/learnable p via SMEM)."""
    p = p_ref[0]
    x = x_ref[...].astype(jnp.float32)
    xc = jnp.maximum(x, eps)
    xp = jnp.exp(p * jnp.log(xc))                 # xc >= eps > 0, safe
    o_ref[...] = jnp.sum(xp, axis=-1, keepdims=True) * inv_hw


def gem_pooling_2d(x, p=None, eps: float = 1e-6, static_p=None):
    """JAX/Pallas equivalent of GEMPooling2d.forward.

    Args:
      x:        (B, C, H, W) input feature map (any float dtype; math in f32).
      p:        (1,) learnable exponent (used when static_p is None).
      eps:      clamp floor.
      static_p: optional compile-time integer exponent (>= 1) enabling the VPU
                fast path (matches the module default p=3).

    Returns:
      (B, C, 1, 1) pooled output, dtype of x.
    """
    B, C, H, W = x.shape
    N = B * C
    HW = H * W

    # Lane-dense layout: reduction axis (H*W) on lanes, one (b, c) pair per
    # sublane row.  Streamed in native dtype; the f32 cast happens in-kernel.
    # TODO(synk): for small, non-128-multiple spatial sizes (e.g. 7x7, 14x14) a
    # channels-last (B*H*W, C) layout with a sublane reduction would be fully
    # lane-dense; the (N, HW) layout below runs at HW/128 lane utilization.
    x2 = x.reshape(N, HW)

    itemsize = jnp.dtype(x.dtype).itemsize
    sub = max(8, 32 // itemsize)                  # sublane multiple: 8 f32, 16 bf16
    bytes_per_row = HW * itemsize

    # Tile sizing: blocks capped at ~8 MiB (a double-buffered input stays well
    # under the 32 MiB scoped-VMEM limit set below), rebalanced to near-even
    # tiles, and forced to >= 2 tiles for non-trivial N so the "parallel" grid
    # axis can be sharded across both v7x TensorCores.
    max_block_bytes = 8 * 1024 * 1024
    max_rows = max(sub, (max_block_bytes // max(bytes_per_row, 1)) // sub * sub)
    n_pad0 = _round_up(N, sub)
    num_tiles = _cdiv(n_pad0, max_rows)
    if n_pad0 >= 2 * sub:
        num_tiles = max(num_tiles, 2)
    tn = _round_up(_cdiv(n_pad0, num_tiles), sub)
    n_pad = num_tiles * tn
    if n_pad != N:
        # Zero-pad: padded rows clamp to eps and produce finite means that are
        # sliced off below.
        x2 = jnp.pad(x2, ((0, n_pad - N), (0, 0)))

    x_spec = pl.BlockSpec((tn, HW), lambda i: (i, 0))
    out_spec = pl.BlockSpec((tn, 1), lambda i: (i, 0))
    out_shape = jax.ShapeDtypeStruct((n_pad, 1), jnp.float32)
    cparams = pltpu.CompilerParams(
        dimension_semantics=("parallel",),
        vmem_limit_bytes=32 * 1024 * 1024,
    )

    if static_p is not None:
        p_int = int(static_p)
        if p_int != static_p or p_int < 1:
            raise ValueError("static_p must be a positive integer")
        mean = pl.pallas_call(
            functools.partial(_gem_mean_static_kernel, eps=float(eps),
                              inv_hw=1.0 / float(HW), p_int=p_int),
            out_shape=out_shape,
            grid=(num_tiles,),
            in_specs=[x_spec],
            out_specs=out_spec,
            compiler_params=cparams,
        )(x2)
        # Lane-dense epilogue on the tiny (N, 1) mean: ^(1/p).
        root = jnp.power(mean[:N], 1.0 / float(p_int))
    else:
        p_arr = jnp.asarray(p, dtype=jnp.float32).reshape((1,))
        mean = pl.pallas_call(
            functools.partial(_gem_mean_dynamic_kernel, eps=float(eps),
                              inv_hw=1.0 / float(HW)),
            out_shape=out_shape,
            grid=(num_tiles,),
            in_specs=[pl.BlockSpec(memory_space=pltpu.MemorySpace.SMEM), x_spec],
            out_specs=out_spec,
            compiler_params=cparams,
        )(p_arr, x2)
        # Lane-dense epilogue on the tiny (N, 1) mean: ^(1/p) with runtime p.
        root = jnp.power(mean[:N], 1.0 / p_arr)

    return root.reshape(B, C, 1, 1).astype(x.dtype)


def _reference_numpy(x: np.ndarray, p: float, eps: float) -> np.ndarray:
    """Direct NumPy port of the PyTorch forward, computed in f64."""
    x64 = x.astype(np.float64)
    xc = np.clip(x64, eps, None)
    pooled = np.mean(np.power(xc, p), axis=(2, 3), keepdims=True)
    return np.power(pooled, 1.0 / p).astype(np.float32)


if __name__ == "__main__":
    key = jax.random.PRNGKey(0)
    B, C, H, W = 2, 4, 16, 16
    x = jax.random.normal(key, (B, C, H, W), dtype=jnp.float32)

    p_value = 3.0
    eps = 1e-6
    p = jnp.ones((1,), dtype=jnp.float32) * p_value   # nn.Parameter(torch.ones(1) * p)

    # Fast path (compile-time integer p == module default) ...
    out_fast = gem_pooling_2d(x, eps=eps, static_p=3)
    out_fast = jax.block_until_ready(out_fast)
    # ... and the general learnable-p path (runtime scalar via SMEM + log/exp).
    out_gen = gem_pooling_2d(x, p=p, eps=eps)
    out_gen = jax.block_until_ready(out_gen)

    assert out_fast.shape == (B, C, 1, 1), out_fast.shape
    assert out_gen.shape == (B, C, 1, 1), out_gen.shape

    ref = _reference_numpy(np.asarray(x), p_value, eps)
    np.testing.assert_allclose(np.asarray(out_fast), ref, rtol=1e-4, atol=1e-5)
    np.testing.assert_allclose(np.asarray(out_gen), ref, rtol=1e-4, atol=1e-5)

    print("KERNEL_OK")
</pallas_src>

<mosaic_0001>
module attributes {stable_mosaic.version = 11 : i64} {
  func.func @_gem_mean_static_kernel(%arg0: i32, %arg1: memref<8x256xf32, #tpu.memory_space<vmem>>, %arg2: memref<8x1xf32, #tpu.memory_space<vmem>>) attributes {dimension_semantics = [#tpu.dimension_semantics<parallel>], iteration_bounds = array<i64: 1>, scalar_prefetch = 0 : i64, scratch_operands = 0 : i64, tpu.core_type = #tpu.core_type<tc>, window_params = [{transform_indices = @transform_0, window_bounds = array<i64: 8, 256>}, {transform_indices = @transform_1, window_bounds = array<i64: 8, 1>}]} {
    %c0 = arith.constant 0 : index
    %c0_0 = arith.constant 0 : index
    %0 = vector.load %arg1[%c0, %c0_0] : memref<8x256xf32, #tpu.memory_space<vmem>>, vector<8x256xf32>
    %cst = arith.constant 9.99999997E-7 : f32
    %1 = vector.broadcast %cst : f32 to vector<8x256xf32>
    %2 = arith.maximumf %0, %1 : vector<8x256xf32>
    %3 = arith.mulf %2, %2 : vector<8x256xf32>
    %4 = arith.mulf %2, %3 : vector<8x256xf32>
    %cst_1 = arith.constant dense<0.000000e+00> : vector<8xf32>
    %5 = vector.multi_reduction <add>, %4, %cst_1 [1] : vector<8x256xf32> to vector<8xf32>
    %6 = vector.shape_cast %5 : vector<8xf32> to vector<8x1xf32>
    %cst_2 = arith.constant 3.906250e-03 : f32
    %7 = vector.broadcast %cst_2 : f32 to vector<8x1xf32>
    %8 = arith.mulf %6, %7 : vector<8x1xf32>
    %c0_3 = arith.constant 0 : index
    %c0_4 = arith.constant 0 : index
    %9 = vector.load %arg2[%c0_3, %c0_4] : memref<8x1xf32, #tpu.memory_space<vmem>>, vector<8x1xf32>
    tpu.vector_store %arg2[%c0_3, %c0_4], %8 {strides = array<i32>} : memref<8x1xf32, #tpu.memory_space<vmem>>, vector<8x1xf32>,
    return
  }
  func.func @transform_0(%arg0: i32) -> (i32, i32) {
    %c0_i32 = arith.constant 0 : i32
    %c0_i32_0 = arith.constant 0 : i32
    return %arg0, %c0_i32 : i32, i32
  }
  func.func @transform_1(%arg0: i32) -> (i32, i32) {
    %c0_i32 = arith.constant 0 : i32
    %c0_i32_0 = arith.constant 0 : i32
    return %arg0, %c0_i32 : i32, i32
  }
}

</mosaic_0001>

<bundles_post_ra>
// kernel: tpu_custom_call.1
= control target key start
LH: loop header
LB: loop body
LE: loop exit
PB: predicated region body
PF: predicated region fallthrough
CT: control target
= control target key end

     0   :  { %6 = vsyncpa [#allocation3], 0  ;;  %s62_s6 = smov [#allocation2]   ;;  %s79_s0 = inlined_call_operand.hbm [shape: f32[8,256], index: 0, kind: input, shape index: {}]   ;;  %s80_s1 = inlined_call_operand.vmem [shape: f32[8,1], index: 1, kind: output, shape index: {}]  }
   0x1   :  { %s13_s7 = sshll.u32 %s62_s6, 4  ;;  %s14_s7 = int_to_ptr.vmem [resolvable:$true] %s13_s7 }
   0x2   :  { %s48_s8 = scalar_lea.vmem %s14_s7, 256  ;;  %p53_p1 = scmp.lt.s32.totalorder %s14_s7, %s14_s7 }
   0x3   :  { %p49_p0 = scmp.ne.s32.totalorder %s14_s7, %s48_s8  ;;  %p54_p2 = scmp.lt.s32.totalorder %s48_s8, %s48_s8 }
   0x5   :  { %p55_p3 = por %p54_p2, %p53_p1 }
   0x7   :  { %p56_p4 = pnand %p55_p3, %p49_p0 }
   0x9   :  { %59 = shalt.err (!%p56_p4)
}
   0xa   :  { %16 = dma.hbm_to_vmem [thread:$0]  %s79_s0, 256, %s14_s7, [#allocation3]  }
   0xb   :  { %60 = dma.done.wait [#allocation3], 256  }
   0xc   :  { %61 = vsyncadd [#allocation3], 4294967040  ;;  %v20_v0 = vld [vmem:[#allocation2] sm:$0xff]  ;;  %v21_v1 = vld [vmem:[#allocation2 + $0x8] sm:$0xff]  ;;  %vm32_vm0 = vcmask 7168  }
   0xd   :  { %v22_v2 = vmax.f32 %v20_v0, 1e-06  ;;  %v23_v3 = vmax.f32 %v21_v1, 1e-06 }
   0xf   :  { %v24_v4 = vmul.f32 %v22_v2, %v22_v2  ;;  %v25_v5 = vmul.f32 %v23_v3, %v23_v3 }
  0x11   :  { %v26_v6 = vmul.f32 %v24_v4, %v22_v2  ;;  %v27_v7 = vmul.f32 %v25_v5, %v23_v3 }
  0x13   :  { %v28_v8 = vadd.f32 %v27_v7, %v26_v6 }
  0x15   :  { %29 = vadd.xlane.f32.xlu0 %v28_v8 }
  0x9e   :  { %v30_v9 = vpop.xlane.xlu0 %29 }
  0x9f   :  { %v31_v10 = vmul.f32 0.00390625, %v30_v9 }
  0xa1   :  { %33 = vst.msk [vmem:[%s80_s1] sm:$0xff] %vm32_vm0, %v31_v10 }
  0xa2   :  { %38 = vsyncpa [#allocation3], 1 }

</bundles_post_ra>
